<compile_context>
chip_gen: v7x
topology: tpu7x:2x2x1
jax: 0.10.0
libtpu: 0.0.40
codegen_flags: <defaults>
</compile_context>

<pallas_src>
import math

import jax
import jax.numpy as jnp
from jax.experimental import pallas as pl
from jax.experimental.pallas import tpu as pltpu


# ---------------------------------------------------------------------------
# Kernel
# ---------------------------------------------------------------------------
def _grouped_expand_kernel(x_ref, e_ref, b_ref, o_ref):
    """out[b, i*D+d] = bias_g[i, d] + weight_g[i, d] * x_g[b, i] for one block.

    x_ref: (TB, Fg)     batch tile of this feature group's input columns
    e_ref: (Fg, Fg*D)   per-group expansion matrix E_g[i, i*D+d] = weight_g[i, d]
    b_ref: (1,  Fg*D)   per-group flattened bias
    o_ref: (TB, Fg*D)   lane-dense output block
    """
    x = x_ref[...].astype(jnp.float32)
    # Single nonzero per contraction column; Mosaic's f32 matmul keeps this
    # well within the 1e-5 tolerance (validated on-device previously).
    acc = jnp.dot(x, e_ref[...], preferred_element_type=jnp.float32)
    o_ref[...] = (acc + b_ref[...]).astype(o_ref.dtype)


# ---------------------------------------------------------------------------
# Helpers
# ---------------------------------------------------------------------------
def _round_up(v: int, m: int) -> int:
    return ((v + m - 1) // m) * m


def _vmem_capacity_bytes() -> int:
    """Detected per-core VMEM capacity; conservative 64 MiB (v7x) fallback."""
    try:
        info = pltpu.get_tpu_info()
        cap = getattr(info, "vmem_capacity_bytes", None)
        if cap:
            return int(cap)
    except Exception:
        pass
    return 64 << 20


def _pick_feature_group(n_features: int, d_embedding: int) -> int:
    """Fg such that Fg*D is a multiple of 128 lanes (target >= 512 lanes)."""
    del n_features  # grouping is driven by lane alignment, not F
    fg = 128 // math.gcd(d_embedding, 128)   # smallest fg with (fg*D) % 128 == 0
    while fg * d_embedding < 512 and fg < 64:
        fg *= 2
    return fg


def _pick_batch_tile(batch: int, out_block_row_bytes: int, budget_bytes: int) -> int:
    """Largest multiple-of-8 tile whose output block stays within budget."""
    tb = budget_bytes // max(out_block_row_bytes, 1)
    tb = max(8, min(4096, (tb // 8) * 8))
    return min(tb, _round_up(batch, 8))


def _vmem_limit(bytes_needed: int, capacity: int) -> int:
    # headroom for compiler scratch, clamped below the physical ceiling.
    return int(min(max(bytes_needed + (4 << 20), 16 << 20), capacity - (8 << 20)))


# ---------------------------------------------------------------------------
# Wrapper
# ---------------------------------------------------------------------------
def ft_transformer_linear_embeddings(x, weight, bias, *, batch_tile=None,
                                     feature_group=None):
    """Pallas equivalent of FTTransformerLinearEmbeddings.forward.

    Args:
      x:      (*, n_features)
      weight: (n_features, d_embedding)
      bias:   (n_features, d_embedding)
    Returns:
      (*, n_features, d_embedding)
    """
    n_features, d_embedding = weight.shape
    if x.ndim < 1:
        raise ValueError(
            f"The input must have at least one dimension, however: x.ndim={x.ndim!r}")
    if x.shape[-1] != n_features:
        raise ValueError(
            f"The last dimension of the input was expected to be {n_features}, "
            f"however, x.shape[-1]={x.shape[-1]!r}")

    out_dtype = jnp.result_type(x.dtype, weight.dtype, bias.dtype)
    out_itemsize = jnp.dtype(out_dtype).itemsize
    lead_shape = x.shape[:-1]
    batch = math.prod(lead_shape) if lead_shape else 1

    # --- feature grouping ---------------------------------------------------
    fg = feature_group if feature_group is not None else _pick_feature_group(
        n_features, d_embedding)
    num_groups = pl.cdiv(n_features, fg)
    f_pad = num_groups * fg
    fd_g = fg * d_embedding          # lanes per output block (multiple of 128)
    fd_pad = f_pad * d_embedding

    x2d = x.reshape(batch, n_features)
    if f_pad != n_features:
        x2d = jnp.pad(x2d, ((0, 0), (0, f_pad - n_features)))
    x_itemsize = jnp.dtype(x2d.dtype).itemsize

    # --- batch tiling (generation-aware byte budget) ------------------------
    capacity = _vmem_capacity_bytes()
    out_block_budget = capacity // 16          # ~4 MiB on v7x, ~8 MiB on v5e/v6e
    tb = batch_tile if batch_tile is not None else _pick_batch_tile(
        batch, fd_g * out_itemsize, out_block_budget)
    tb = max(8, (tb // 8) * 8)
    num_tiles = pl.cdiv(batch, tb)
    b_pad = num_tiles * tb
    if b_pad != batch:
        x2d = jnp.pad(x2d, ((0, b_pad - batch), (0, 0)))

    # Grouped x layout: (num_groups, b_pad, fg) so every block's minor dim is
    # the full fg extent (satisfies the (8, 128) BlockSpec rule for any fg).
    xg = x2d.reshape(b_pad, num_groups, fg).transpose(1, 0, 2)

    # --- per-group expansion matrices and bias (built in f32) ---------------
    w32 = weight.astype(jnp.float32)
    b32 = bias.astype(jnp.float32)
    if f_pad != n_features:
        w32 = jnp.pad(w32, ((0, f_pad - n_features), (0, 0)))
        b32 = jnp.pad(b32, ((0, f_pad - n_features), (0, 0)))
    w3 = w32.reshape(num_groups, fg, d_embedding)
    eye_fg = jnp.eye(fg, dtype=jnp.float32)
    # E[g, i, i'*D + d] = weight[g*fg + i, d] iff i == i' else 0   (O(F*Fg*D) work)
    expansion = (eye_fg[None, :, :, None] * w3[:, None, :, :]).reshape(
        num_groups, fg, fd_g)
    bias_g = b32.reshape(num_groups, 1, fd_g)

    # --- VMEM plan / cost hint ----------------------------------------------
    vmem_needed = (2 * tb * fg * x_itemsize          # x tiles (double buffered)
                   + 2 * fg * fd_g * 4               # expansion block
                   + 2 * 8 * fd_g * 4                # bias block (sublane-padded)
                   + 2 * tb * fd_g * out_itemsize)   # output tiles
    cost = pl.CostEstimate(
        flops=2 * b_pad * fd_pad * fg + b_pad * fd_pad,
        transcendentals=0,
        bytes_accessed=(b_pad * f_pad * x_itemsize
                        + num_groups * fg * fd_g * 4
                        + f_pad * d_embedding * 4
                        + b_pad * fd_pad * out_itemsize),
    )

    out_flat = pl.pallas_call(
        _grouped_expand_kernel,
        out_shape=jax.ShapeDtypeStruct((b_pad, fd_pad), out_dtype),
        grid_spec=pltpu.PrefetchScalarGridSpec(
            num_scalar_prefetch=0,
            grid=(num_tiles, num_groups),
            in_specs=[
                pl.BlockSpec((None, tb, fg), lambda i, g: (g, i, 0)),
                pl.BlockSpec((None, fg, fd_g), lambda i, g: (g, 0, 0)),
                pl.BlockSpec((None, 1, fd_g), lambda i, g: (g, 0, 0)),
            ],
            out_specs=pl.BlockSpec((tb, fd_g), lambda i, g: (i, g)),
        ),
        compiler_params=pltpu.CompilerParams(
            dimension_semantics=("parallel", "parallel"),
            vmem_limit_bytes=_vmem_limit(vmem_needed, capacity),
        ),
        cost_estimate=cost,
    )(xg, expansion, bias_g)

    out = out_flat[:batch, : n_features * d_embedding]
    return out.reshape(*lead_shape, n_features, d_embedding)


# ---------------------------------------------------------------------------
# Demo / correctness check
# ---------------------------------------------------------------------------
if __name__ == "__main__":
    batch_size = 2
    n_features = 8
    d_embedding = 32

    key = jax.random.PRNGKey(0)
    kx, kw, kb = jax.random.split(key, 3)

    # Parameter init mirroring reset_parameters(): uniform(-D**-0.5, D**-0.5).
    d_rsqrt = d_embedding ** (-0.5)
    weight = jax.random.uniform(
        kw, (n_features, d_embedding), minval=-d_rsqrt, maxval=d_rsqrt,
        dtype=jnp.float32)
    bias = jax.random.uniform(
        kb, (n_features, d_embedding), minval=-d_rsqrt, maxval=d_rsqrt,
        dtype=jnp.float32)

    x = jax.random.normal(kx, (batch_size, n_features), dtype=jnp.float32)

    out = ft_transformer_linear_embeddings(x, weight, bias)
    out = jax.block_until_ready(out)

    # Reference (same semantics as torch.addcmul).
    ref = bias[None, :, :] + weight[None, :, :] * x[:, :, None]
    assert out.shape == (batch_size, n_features, d_embedding), out.shape
    assert out.dtype == jnp.float32, out.dtype
    assert jnp.allclose(out, ref, atol=1e-5, rtol=1e-5), "mismatch vs reference"

    # Also exercise a multi-group / multi-tile configuration for coverage.
    x_big = jax.random.normal(kx, (3, 5, n_features), dtype=jnp.float32)
    out_big = jax.block_until_ready(
        ft_transformer_linear_embeddings(x_big, weight, bias,
                                         batch_tile=8, feature_group=4))
    ref_big = bias[None, None] + weight[None, None] * x_big[..., None]
    assert out_big.shape == (3, 5, n_features, d_embedding), out_big.shape
    assert jnp.allclose(out_big, ref_big, atol=1e-5, rtol=1e-5), "grouped mismatch"

    print("KERNEL_OK")
</pallas_src>

<mosaic_0001>
module attributes {stable_mosaic.version = 11 : i64} {
  func.func @_grouped_expand_kernel(%arg0: i32, %arg1: i32, %arg2: memref<1x8x16xf32, #tpu.memory_space<vmem>>, %arg3: memref<1x16x512xf32, #tpu.memory_space<vmem>>, %arg4: memref<1x1x512xf32, #tpu.memory_space<vmem>>, %arg5: memref<8x512xf32, #tpu.memory_space<vmem>>) attributes {dimension_semantics = [#tpu.dimension_semantics<parallel>, #tpu.dimension_semantics<parallel>], iteration_bounds = array<i64: 1, 1>, scalar_prefetch = 0 : i64, scratch_operands = 0 : i64, tpu.core_type = #tpu.core_type<tc>, window_params = [{transform_indices = @transform_0, window_bounds = array<i64: 1, 8, 16>}, {transform_indices = @transform_1, window_bounds = array<i64: 1, 16, 512>}, {transform_indices = @transform_2, window_bounds = array<i64: 1, 1, 512>}, {transform_indices = @transform_3, window_bounds = array<i64: 8, 512>}]} {
    %c0 = arith.constant 0 : index
    %c0_0 = arith.constant 0 : index
    %c0_1 = arith.constant 0 : index
    %0 = vector.load %arg2[%c0, %c0_0, %c0_1] : memref<1x8x16xf32, #tpu.memory_space<vmem>>, vector<1x8x16xf32>
    %1 = vector.shape_cast %0 : vector<1x8x16xf32> to vector<8x16xf32>
    %c0_2 = arith.constant 0 : index
    %c0_3 = arith.constant 0 : index
    %c0_4 = arith.constant 0 : index
    %2 = vector.load %arg3[%c0_2, %c0_3, %c0_4] : memref<1x16x512xf32, #tpu.memory_space<vmem>>, vector<1x16x512xf32>
    %3 = vector.shape_cast %2 : vector<1x16x512xf32> to vector<16x512xf32>
    %cst = arith.constant dense<0.000000e+00> : vector<8x512xf32>
    %4 = tpu.matmul %1, %3, %cst {dimension_numbers = #tpu.dot_dimension_numbers<[1], [0], [0], [1], [0, 0, 1, 1], [], []>} : vector<8x16xf32>, vector<16x512xf32>, vector<8x512xf32> -> vector<8x512xf32>
    %c0_5 = arith.constant 0 : index
    %c0_6 = arith.constant 0 : index
    %c0_7 = arith.constant 0 : index
    %5 = vector.load %arg4[%c0_5, %c0_6, %c0_7] : memref<1x1x512xf32, #tpu.memory_space<vmem>>, vector<1x1x512xf32>
    %6 = vector.shape_cast %5 : vector<1x1x512xf32> to vector<1x512xf32>
    %7 = vector.broadcast %6 : vector<1x512xf32> to vector<8x512xf32>
    %8 = arith.addf %4, %7 : vector<8x512xf32>
    %c0_8 = arith.constant 0 : index
    %c0_9 = arith.constant 0 : index
    %9 = vector.load %arg5[%c0_8, %c0_9] : memref<8x512xf32, #tpu.memory_space<vmem>>, vector<8x512xf32>
    tpu.vector_store %arg5[%c0_8, %c0_9], %8 {strides = array<i32>} : memref<8x512xf32, #tpu.memory_space<vmem>>, vector<8x512xf32>,
    return
  }
  func.func @transform_0(%arg0: i32, %arg1: i32) -> (i32, i32, i32) {
    %c0_i32 = arith.constant 0 : i32
    %c0_i32_0 = arith.constant 0 : i32
    return %arg1, %arg0, %c0_i32 : i32, i32, i32
  }
  func.func @transform_1(%arg0: i32, %arg1: i32) -> (i32, i32, i32) {
    %c0_i32 = arith.constant 0 : i32
    %c0_i32_0 = arith.constant 0 : i32
    %c0_i32_1 = arith.constant 0 : i32
    return %arg1, %c0_i32, %c0_i32_0 : i32, i32, i32
  }
  func.func @transform_2(%arg0: i32, %arg1: i32) -> (i32, i32, i32) {
    %c0_i32 = arith.constant 0 : i32
    %c0_i32_0 = arith.constant 0 : i32
    %c0_i32_1 = arith.constant 0 : i32
    return %arg1, %c0_i32, %c0_i32_0 : i32, i32, i32
  }
  func.func @transform_3(%arg0: i32, %arg1: i32) -> (i32, i32) {
    %c0_i32 = arith.constant 0 : i32
    return %arg0, %arg1 : i32, i32
  }
}

</mosaic_0001>

<bundles_post_ra>
// kernel: tpu_custom_call.1
= control target key start
LH: loop header
LB: loop body
LE: loop exit
PB: predicated region body
PF: predicated region fallthrough
CT: control target
= control target key end

     0   :  { %8 = vsyncpa [#allocation3], 0  ;;  %s398_s0 = inlined_call_operand.hbm [shape: f32[1,8,16], index: 0, kind: input, shape index: {}]   ;;  %s399_s1 = inlined_call_operand.hbm [shape: f32[1,16,512], index: 1, kind: input, shape index: {}]   ;;  %s400_s2 = inlined_call_operand.vmem [shape: f32[1,1,512], index: 2, kind: input, shape index: {}]   ;;  %s401_s3 = inlined_call_operand.hbm [shape: f32[8,512], index: 3, kind: output, shape index: {}]  }
   0x1   :  { %9 = vsyncpa [#allocation6], 0 }
   0x2   :  { %10 = vsyncpa [#allocation4], 0  ;;  %s326_s12 = smov [#allocation2]   ;;  %s327_s14 = smov [#allocation5]  }
   0x3   :  { %s17_s13 = sshll.u32 %s326_s12, 4  ;;  %s26_s15 = sshll.u32 %s327_s14, 4  ;;  %s18_s13 = int_to_ptr.vmem [resolvable:$true] %s17_s13  ;;  %s352_s15 = int_to_ptr.vmem [resolvable:$true] %s26_s15 }
   0x4   :  { %s254_s18 = scalar_lea.hbm %s398_s0, 128 }
   0x5   :  { %p255_p0 = scmp.ne.s32.totalorder %s398_s0, %s254_s18  ;;  %p258_p1 = scmp.lt.u32.totalorder %s254_s18, %s398_s0 }
   0x7   :  { %p260_p2 = pnand %p258_p1, %p255_p0 }
   0x9   :  { %263 = shalt.err (!%p260_p2)
}
   0xa   :  { %s264_s23 = scalar_lea.vmem %s18_s13, 128  ;;  %p269_p4 = scmp.lt.s32.totalorder %s18_s13, %s18_s13 }
   0xb   :  { %p265_p3 = scmp.ne.s32.totalorder %s18_s13, %s264_s23  ;;  %p270_p5 = scmp.lt.s32.totalorder %s264_s23, %s264_s23 }
   0xd   :  { %p271_p6 = por %p270_p5, %p269_p4 }
   0xf   :  { %p272_p7 = pnand %p271_p6, %p265_p3 }
  0x11   :  { %275 = shalt.err (!%p272_p7)
}
  0x12   :  { %20 = dma.hbm_to_vmem [thread:$0]  %s398_s0, 128, %s18_s13, [#allocation3]  }
  0x13   :  { %s276_s28 = scalar_lea.hbm %s399_s1, 1024 }
  0x14   :  { %p277_p8 = scmp.ne.s32.totalorder %s399_s1, %s276_s28  ;;  %p280_p9 = scmp.lt.u32.totalorder %s276_s28, %s399_s1 }
  0x16   :  { %p282_p10 = pnand %p280_p9, %p277_p8 }
  0x18   :  { %285 = shalt.err (!%p282_p10)
}
  0x19   :  { %s286_s6 = scalar_lea.vmem %s352_s15, 1024  ;;  %p291_p12 = scmp.lt.s32.totalorder %s352_s15, %s352_s15 }
  0x1a   :  { %p287_p11 = scmp.ne.s32.totalorder %s352_s15, %s286_s6  ;;  %p292_p13 = scmp.lt.s32.totalorder %s286_s6, %s286_s6 }
  0x1c   :  { %p293_p0 = por %p292_p13, %p291_p12 }
  0x1e   :  { %p294_p1 = pnand %p293_p0, %p287_p11 }
  0x20   :  { %297 = shalt.err (!%p294_p1)
}
  0x21   :  { %s328_s0 = smov 512   ;;  %s329_s7 = smov 32  }
  0x22   :  { %32 = dma.hbm_to_vmem [thread:$0]  %s399_s1, 1024, %s352_s15, [#allocation6], %s328_s0, %s328_s0, %s329_s7  }
  0x23   :  { %320 = dma.done.wait [#allocation3], 128  }
  0x24   :  { %321 = vsyncadd [#allocation3], 4294967168 }
  0x25   :  { %322 = dma.done.wait [#allocation6], 1024  }
  0x26   :  { %323 = vsyncadd [#allocation6], 4294966272  ;;  %v330_v0 = vmov 0.0   ;;  %v43_v1 = vld [vmem:[#allocation5 + $0x8] sm:$0xff]  ;;  %v45_v3 = vld [vmem:[#allocation5 + $0x18] sm:$0xff]  ;;  %vm72_vm0 = vcmask 130048   ;;  %v52_v14 = vlaneseq }
  0x27   :  { %140 = vmatprep.mubr.f32.mxu0 %v330_v0  ;;  %211 = vmatprep.mubr.f32.mxu1 %v330_v0  ;;  %v47_v2 = vld [vmem:[#allocation5 + $0x28] sm:$0xff]  ;;  %v49_v5 = vld [vmem:[#allocation5 + $0x38] sm:$0xff]  ;;  %v42_v6 = vld [vmem:[#allocation5] sm:$0xff]  ;;  %s331_s11 = smov [#allocation7]  }
  0x28   :  { %v240_v4 = vpack.c.bf16 %v47_v2, %v43_v1  ;;  %v46_v7 = vld [vmem:[#allocation5 + $0x20] sm:$0xff]  ;;  %v244_v8 = vpack.c.bf16 %v49_v5, %v45_v3  ;;  %v44_v10 = vld [vmem:[#allocation5 + $0x10] sm:$0xff]  ;;  %v41_v13 = vld [vmem:[#allocation2] sm:$0xff]  ;;  %v53_v15 = vshrl.u32 %v52_v14, 7  ;;  %s228_s12 = sshll.u32 %s331_s11, 4  ;;  %s229_s12 = int_to_ptr.vmem [resolvable:$true] %s228_s12 }
  0x29   :  { %v242_v9 = vpack.c.bf16 %v46_v7, %v42_v6  ;;  %v48_v11 = vld [vmem:[#allocation5 + $0x30] sm:$0xff]  ;;  %v50_v17 = vld [vmem:[%s400_s2] sm:$0xf]  ;;  %s298_s2 = scalar_lea.vmem %s229_s12, 512  ;;  %p303_p3 = scmp.lt.s32.totalorder %s229_s12, %s229_s12 }
  0x2a   :  { %241 = vmatprep.subr.bf16.mxu0 %v240_v4  ;;  %v246_v12 = vpack.c.bf16 %v48_v11, %v44_v10  ;;  %245 = vmatprep.subr.bf16.mxu1 %v244_v8  ;;  %v54_v16 = vsub.s32 0, %v53_v15  ;;  %v62_v18 = vsub.s32 2, %v53_v15  ;;  %v58_v19 = vsub.s32 1, %v53_v15  ;;  %p299_p2 = scmp.ne.s32.totalorder %s229_s12, %s298_s2  ;;  %p304_p4 = scmp.lt.s32.totalorder %s298_s2, %s298_s2 }
  0x2b   :  { %243 = vmatpush1.bf16.msra.mxu0 %v242_v9  ;;  %v66_v20 = vsub.s32 3, %v53_v15 }
  0x2c   :  { %247 = vmatpush1.bf16.msra.mxu1 %v246_v12  ;;  %v55_v21 = vrot.slane %v50_v17, %v54_v16  ;;  %v63_v22 = vrot.slane %v50_v17, %v62_v18  ;;  %v59_v23 = vrot.slane %v50_v17, %v58_v19  ;;  %p305_p5 = por %p304_p4, %p303_p3 }
  0x2d   :  { %v67_v24 = vrot.slane %v50_v17, %v66_v20 }
  0x2e   :  { %238 = vmatmul.mubr.msk.f32.vlgmr.msra.gmra.mrb[0].mxu0 %vm72_vm0, %v41_v13  ;;  %p306_p6 = pnand %p305_p5, %p299_p2 }
  0x2f   :  { %239 = vmatmul.mubr.msk.f32.vlgmr.msra.gmra.mrb[0].mxu1 %vm72_vm0, %v41_v13 }
 0x101   :  { %v142_v25 = vpop.f32.mrb[0].mxu0 }
 0x102   :  { %v143_v26 = vadd.f32 %v142_v25, %v55_v21  ;;  %v213_v27 = vpop.f32.mrb[0].mxu1  ;;  %v144_v28 = vpop.f32.mrb[1].mxu0 }
 0x103   :  { %v214_v29 = vadd.f32 %v213_v27, %v63_v22  ;;  %v145_v30 = vadd.f32 %v144_v28, %v59_v23  ;;  %v215_v31 = vpop.f32.mrb[1].mxu1 }
 0x104   :  { %218 = vst [vmem:[#allocation7] sm:$0xff] %v143_v26  ;;  %v216_v32 = vadd.f32 %v215_v31, %v67_v24 }
 0x105   :  { %220 = vst [vmem:[#allocation7 + $0x10] sm:$0xff] %v214_v29  ;;  %219 = vst [vmem:[#allocation7 + $0x8] sm:$0xff] %v145_v30 }
 0x106   :  { %221 = vst [vmem:[#allocation7 + $0x18] sm:$0xff] %v216_v32 }
 0x107   :  { %309 = shalt.err (!%p306_p6)
}
 0x108   :  { %s310_s15 = scalar_lea.hbm %s401_s3, 512 }
 0x109   :  { %p311_p7 = scmp.ne.s32.totalorder %s401_s3, %s310_s15  ;;  %p314_p8 = scmp.lt.u32.totalorder %s310_s15, %s401_s3 }
 0x10b   :  { %p316_p9 = pnand %p314_p8, %p311_p7 }
 0x10d   :  { %319 = shalt.err (!%p316_p9)
}
 0x10e   :  { %231 = dma.vmem_to_hbm [thread:$0]  %s229_s12, 512, %s401_s3, [#allocation4]  }
 0x10f   :  { %324 = dma.done.wait [#allocation4], 512  }
 0x110   :  { %325 = vsyncadd [#allocation4], 4294966784 }
 0x111   :  { %235 = vsyncpa [#allocation3], 1 }
 0x112   :  { %236 = vsyncpa [#allocation6], 1 }
 0x113   :  { %237 = vsyncpa [#allocation4], 1 }

</bundles_post_ra>
